<compile_context>
chip_gen: v5e
topology: v5e:2x2
jax: 0.10.0
libtpu: 0.0.40
codegen_flags: <defaults>
</compile_context>

<pallas_src>
import functools

import jax
import jax.numpy as jnp
from jax.experimental import pallas as pl
from jax.experimental.pallas import tpu as pltpu


def _round_up(x, m):
    return (x + m - 1) // m * m


def _vmem_capacity_bytes():
    try:
        info = pltpu.get_tpu_info()
        cap = getattr(info, "vmem_capacity_bytes", None)
        if cap:
            return int(cap)
    except Exception:
        pass
    return 128 << 20


def _heatmap_loss_kernel(pred_ref, gt_ref, mask_ref, out_ref, *,
                         supervise_empty, inv_khw, single_k_tile):
    p = pred_ref[...].astype(jnp.float32)      # (bn, kt, HWp)
    g = gt_ref[...].astype(jnp.float32)        # (bn, kt, HWp)
    m = mask_ref[...].astype(jnp.float32)      # (bn, 1,  HWp)

    masked = (p - g) ** 2 * m                  # mask broadcasts over the kt axis
    chan = jnp.sum(masked, axis=2)             # (bn, kt) per-channel sums

    if not supervise_empty:
        # Channels are never split across K tiles (HW stays whole), so the
        # empty-channel test is complete within this tile.  Padded K channels
        # have gt == 0 and are excluded automatically.
        empty = (jnp.sum(g, axis=2) > 0).astype(jnp.float32)   # (bn, kt)
        chan = chan * empty

    # Fully vectorized per-image totals; (bn,1) -> (1,bn,1) only adds unit dims.
    tot = (jnp.sum(chan, axis=1, keepdims=True) * inv_khw).reshape(out_ref.shape)

    if single_k_tile:
        out_ref[...] = tot
    else:
        @pl.when(pl.program_id(1) == 0)
        def _init():
            out_ref[...] = jnp.zeros_like(out_ref)

        out_ref[...] += tot


def heatmap_loss(pred, gt, mask, supervise_empty=True, block_bytes_target=None):
    """Pallas TPU implementation of mmpose HeatmapLoss.forward. Returns (N,)."""
    assert pred.shape == gt.shape, f"pred.shape {pred.shape} != gt.shape {gt.shape}"
    N, K, H, W = pred.shape
    assert mask.shape == (N, H, W)
    HW = H * W
    HWp = _round_up(HW, 128)                   # lane-dense, full-width vregs

    # ---- generation-aware VMEM / block budgets ------------------------------
    vmem_cap = _vmem_capacity_bytes()
    if vmem_cap <= (64 << 20):                 # v7x-class: 64 MiB VMEM per TC
        vmem_cap_limit = 48 << 20              # leave internal-scratch headroom
    else:                                      # v5e / v6e: 128 MiB physical
        vmem_cap_limit = 100 << 20

    itemsize = max(jnp.dtype(pred.dtype).itemsize, jnp.dtype(gt.dtype).itemsize)
    # Budget model per grid step:
    #   2 pipeline buffers x (pred + gt) blocks          = 4 * B
    #   ~3 live f32 upcast / intermediate copies          = 3 * B * (4/itemsize)
    #   mask buffers + headroom                            ~ 8 MiB
    if block_bytes_target is None:
        block_bytes_target = int((vmem_cap_limit - (8 << 20)) /
                                 (4.0 + 12.0 / itemsize))
        block_bytes_target = max(block_bytes_target, 1 << 20)

    # ---- tile selection ------------------------------------------------------
    sub_align = max(8, 32 // itemsize)         # 8 f32 / 16 bf16 / 32 int8
    row_bytes = HWp * itemsize                 # one keypoint-channel slab
    per_image = K * row_bytes

    if per_image <= block_bytes_target:
        # Common path: full K per block, several images per grid step.
        kt, K_pad = K, K
        bn = max(1, min(N, block_bytes_target // per_image))
        # Prefer a bn dividing N exactly (avoids an HBM pad copy of the whole
        # input); only pad N when the best divisor is <= half of the max bn.
        div_bn = max(d for d in range(1, bn + 1) if N % d == 0)
        bn = div_bn if div_bn * 2 >= bn else bn
        N_pad = _round_up(N, bn)
    else:
        # Large heatmaps: one image per step, tile K, accumulate across K tiles.
        bn, N_pad = 1, N
        kt_max = max(sub_align,
                     (block_bytes_target // row_bytes) // sub_align * sub_align)
        kt_max = min(kt_max, _round_up(K, sub_align))
        div_kts = [d for d in range(sub_align, kt_max + 1, sub_align)
                   if K % d == 0]
        if div_kts and div_kts[-1] * 2 >= kt_max:
            kt = div_kts[-1]                   # exact divisor: no K padding
        else:
            kt = kt_max                        # pad K to a multiple of kt
        K_pad = _round_up(K, kt)
        # TODO(synk): if even (sub_align x HWp) exceeds the budget (very large
        # heatmaps on 64-MiB-VMEM parts), the HW axis would have to be split,
        # which needs a two-pass empty-channel reduction for
        # supervise_empty=False.

    n_tiles = N_pad // bn
    k_tiles = K_pad // kt

    # ---- explicit VMEM limit (includes the f32 upcast intermediates) --------
    in_block = bn * kt * HWp * itemsize
    mask_block = bn * HWp * 4
    f32_block = bn * kt * HWp * 4
    vmem_needed = 2 * (2 * in_block + mask_block) + 3 * f32_block + (4 << 20)
    vmem_limit = int(min(max(vmem_needed, 32 << 20), vmem_cap_limit))

    # ---- lane-dense (and, where required, zero-padded) operands -------------
    pred2 = pred.reshape(N, K, HW)
    gt2 = gt.reshape(N, K, HW)
    mask2 = mask.reshape(N, 1, HW)
    if not jnp.issubdtype(mask2.dtype, jnp.floating):
        mask2 = mask2.astype(jnp.float32)

    pad_n, pad_k, pad_hw = N_pad - N, K_pad - K, HWp - HW
    if pad_n or pad_k or pad_hw:
        pred2 = jnp.pad(pred2, ((0, pad_n), (0, pad_k), (0, pad_hw)))
        gt2 = jnp.pad(gt2, ((0, pad_n), (0, pad_k), (0, pad_hw)))
    if pad_n or pad_hw:
        mask2 = jnp.pad(mask2, ((0, pad_n), (0, 0), (0, pad_hw)))

    kernel = functools.partial(
        _heatmap_loss_kernel,
        supervise_empty=supervise_empty,
        inv_khw=1.0 / float(K * H * W),        # true (unpadded) denominator
        single_k_tile=(k_tiles == 1),
    )

    out = pl.pallas_call(
        kernel,
        out_shape=jax.ShapeDtypeStruct((n_tiles, bn, 1), jnp.float32),
        grid=(n_tiles, k_tiles),               # reduction (K) axis last
        in_specs=[
            pl.BlockSpec((bn, kt, HWp), lambda i, k: (i, k, 0)),
            pl.BlockSpec((bn, kt, HWp), lambda i, k: (i, k, 0)),
            pl.BlockSpec((bn, 1, HWp), lambda i, k: (i, 0, 0)),
        ],
        # Blocked per-image-tile output, resident across the K axis.  Each
        # image tile owns its own output block, so "parallel" on the image axis
        # is safe (v7x 2-TensorCore sharding).
        out_specs=pl.BlockSpec((1, bn, 1), lambda i, k: (i, 0, 0)),
        compiler_params=pltpu.CompilerParams(
            dimension_semantics=("parallel", "arbitrary"),
            vmem_limit_bytes=vmem_limit,
        ),
    )(pred2, gt2, mask2)

    return out.reshape(N_pad)[:N]


if __name__ == "__main__":
    key = jax.random.PRNGKey(0)
    N, K, H, W = 2, 4, 16, 16
    k1, k2, k3 = jax.random.split(key, 3)

    pred = jax.random.normal(k1, (N, K, H, W), dtype=jnp.float32)
    gt = jnp.abs(jax.random.normal(k2, (N, K, H, W), dtype=jnp.float32))
    gt = gt.at[:, 1].set(0.0)                  # one empty keypoint channel
    mask = (jax.random.uniform(k3, (N, H, W)) > 0.3).astype(jnp.float32)

    # 1) supervise_empty=True (module default); single image tile, single K tile.
    out = heatmap_loss(pred, gt, mask, supervise_empty=True)
    jax.block_until_ready(out)
    ref = jnp.mean((pred - gt) ** 2 * mask[:, None, :, :], axis=(1, 2, 3))
    assert out.shape == (N,)
    assert jnp.allclose(out, ref, atol=1e-5, rtol=1e-5), (out, ref)

    # 2) supervise_empty=False branch.
    out2 = heatmap_loss(pred, gt, mask, supervise_empty=False)
    jax.block_until_ready(out2)
    empty = (jnp.sum(gt, axis=(2, 3), keepdims=True) > 0).astype(jnp.float32)
    ref2 = jnp.mean((pred - gt) ** 2 * empty * mask[:, None, :, :], axis=(1, 2, 3))
    assert jnp.allclose(out2, ref2, atol=1e-5, rtol=1e-5), (out2, ref2)

    # 3) Force the K-tiled accumulator path (bn=1, kt=8, two reduction steps).
    N2, K2, H2, W2 = 2, 16, 8, 16
    k4, k5, k6 = jax.random.split(jax.random.PRNGKey(1), 3)
    pred_b = jax.random.normal(k4, (N2, K2, H2, W2), dtype=jnp.float32)
    gt_b = jnp.abs(jax.random.normal(k5, (N2, K2, H2, W2), dtype=jnp.float32))
    gt_b = gt_b.at[:, 3].set(0.0)
    mask_b = (jax.random.uniform(k6, (N2, H2, W2)) > 0.5).astype(jnp.float32)
    out3 = heatmap_loss(pred_b, gt_b, mask_b, supervise_empty=False,
                        block_bytes_target=4 * 1024)
    jax.block_until_ready(out3)
    empty_b = (jnp.sum(gt_b, axis=(2, 3), keepdims=True) > 0).astype(jnp.float32)
    ref3 = jnp.mean((pred_b - gt_b) ** 2 * empty_b * mask_b[:, None, :, :],
                    axis=(1, 2, 3))
    assert jnp.allclose(out3, ref3, atol=1e-5, rtol=1e-5), (out3, ref3)

    # 4) Multi-image-tile path with a blocked output (bn=2, n_tiles=2, kt=K).
    N3, K3, H3, W3 = 4, 4, 16, 16
    k7, k8, k9 = jax.random.split(jax.random.PRNGKey(2), 3)
    pred_c = jax.random.normal(k7, (N3, K3, H3, W3), dtype=jnp.float32)
    gt_c = jnp.abs(jax.random.normal(k8, (N3, K3, H3, W3), dtype=jnp.float32))
    mask_c = (jax.random.uniform(k9, (N3, H3, W3)) > 0.3).astype(jnp.float32)
    out4 = heatmap_loss(pred_c, gt_c, mask_c, supervise_empty=True,
                        block_bytes_target=2 * K3 * H3 * W3 * 4)
    jax.block_until_ready(out4)
    ref4 = jnp.mean((pred_c - gt_c) ** 2 * mask_c[:, None, :, :], axis=(1, 2, 3))
    assert jnp.allclose(out4, ref4, atol=1e-5, rtol=1e-5), (out4, ref4)

    print("KERNEL_OK")
</pallas_src>

<mosaic_0001>
module attributes {stable_mosaic.version = 11 : i64} {
  func.func @_heatmap_loss_kernel(%arg0: i32, %arg1: i32, %arg2: memref<2x4x256xf32, #tpu.memory_space<vmem>>, %arg3: memref<2x4x256xf32, #tpu.memory_space<vmem>>, %arg4: memref<2x1x256xf32, #tpu.memory_space<vmem>>, %arg5: memref<1x2x1xf32, #tpu.memory_space<vmem>>) attributes {dimension_semantics = [#tpu.dimension_semantics<parallel>, #tpu.dimension_semantics<arbitrary>], iteration_bounds = array<i64: 1, 1>, scalar_prefetch = 0 : i64, scratch_operands = 0 : i64, tpu.core_type = #tpu.core_type<tc>, window_params = [{transform_indices = @transform_0, window_bounds = array<i64: 2, 4, 256>}, {transform_indices = @transform_1, window_bounds = array<i64: 2, 4, 256>}, {transform_indices = @transform_2, window_bounds = array<i64: 2, 1, 256>}, {transform_indices = @transform_3, window_bounds = array<i64: 1, 2, 1>}]} {
    %c0 = arith.constant 0 : index
    %c0_0 = arith.constant 0 : index
    %c0_1 = arith.constant 0 : index
    %0 = vector.load %arg2[%c0, %c0_0, %c0_1] : memref<2x4x256xf32, #tpu.memory_space<vmem>>, vector<2x4x256xf32>
    %c0_2 = arith.constant 0 : index
    %c0_3 = arith.constant 0 : index
    %c0_4 = arith.constant 0 : index
    %1 = vector.load %arg3[%c0_2, %c0_3, %c0_4] : memref<2x4x256xf32, #tpu.memory_space<vmem>>, vector<2x4x256xf32>
    %c0_5 = arith.constant 0 : index
    %c0_6 = arith.constant 0 : index
    %c0_7 = arith.constant 0 : index
    %2 = vector.load %arg4[%c0_5, %c0_6, %c0_7] : memref<2x1x256xf32, #tpu.memory_space<vmem>>, vector<2x1x256xf32>
    %3 = arith.subf %0, %1 : vector<2x4x256xf32>
    %4 = arith.mulf %3, %3 : vector<2x4x256xf32>
    %5 = vector.broadcast %2 : vector<2x1x256xf32> to vector<2x4x256xf32>
    %6 = arith.mulf %4, %5 : vector<2x4x256xf32>
    %cst = arith.constant dense<0.000000e+00> : vector<2x4xf32>
    %7 = vector.multi_reduction <add>, %6, %cst [2] : vector<2x4x256xf32> to vector<2x4xf32>
    %cst_8 = arith.constant dense<0.000000e+00> : vector<2xf32>
    %8 = vector.multi_reduction <add>, %7, %cst_8 [1] : vector<2x4xf32> to vector<2xf32>
    %9 = vector.shape_cast %8 : vector<2xf32> to vector<2x1xf32>
    %cst_9 = arith.constant 9.765625E-4 : f32
    %10 = vector.broadcast %cst_9 : f32 to vector<2x1xf32>
    %11 = arith.mulf %9, %10 : vector<2x1xf32>
    %12 = vector.shape_cast %11 : vector<2x1xf32> to vector<1x2x1xf32>
    %c0_10 = arith.constant 0 : index
    %c0_11 = arith.constant 0 : index
    %c0_12 = arith.constant 0 : index
    %13 = vector.load %arg5[%c0_10, %c0_11, %c0_12] : memref<1x2x1xf32, #tpu.memory_space<vmem>>, vector<1x2x1xf32>
    tpu.vector_store %arg5[%c0_10, %c0_11, %c0_12], %12 {strides = array<i32>} : memref<1x2x1xf32, #tpu.memory_space<vmem>>, vector<1x2x1xf32>,
    return
  }
  func.func @transform_0(%arg0: i32, %arg1: i32) -> (i32, i32, i32) {
    %c0_i32 = arith.constant 0 : i32
    %c0_i32_0 = arith.constant 0 : i32
    return %arg0, %arg1, %c0_i32 : i32, i32, i32
  }
  func.func @transform_1(%arg0: i32, %arg1: i32) -> (i32, i32, i32) {
    %c0_i32 = arith.constant 0 : i32
    %c0_i32_0 = arith.constant 0 : i32
    return %arg0, %arg1, %c0_i32 : i32, i32, i32
  }
  func.func @transform_2(%arg0: i32, %arg1: i32) -> (i32, i32, i32) {
    %c0_i32 = arith.constant 0 : i32
    %c0_i32_0 = arith.constant 0 : i32
    %c0_i32_1 = arith.constant 0 : i32
    return %arg0, %c0_i32, %c0_i32_0 : i32, i32, i32
  }
  func.func @transform_3(%arg0: i32, %arg1: i32) -> (i32, i32, i32) {
    %c0_i32 = arith.constant 0 : i32
    %c0_i32_0 = arith.constant 0 : i32
    %c0_i32_1 = arith.constant 0 : i32
    return %arg0, %c0_i32, %c0_i32_0 : i32, i32, i32
  }
}

</mosaic_0001>

<bundles_post_ra>
// kernel: tpu_custom_call.1
= control target key start
LH: loop header
LB: loop body
LE: loop exit
PB: predicated region body
PF: predicated region fallthrough
CT: control target
= control target key end

     0   :  { %8 = vsyncpa [#allocation3], 0  ;;  %s259_s0 = inlined_call_operand.hbm [shape: f32[2,4,256], index: 0, kind: input, shape index: {}]   ;;  %s260_s1 = inlined_call_operand.hbm [shape: f32[2,4,256], index: 1, kind: input, shape index: {}]   ;;  %s261_s2 = inlined_call_operand.hbm [shape: f32[2,1,256], index: 2, kind: input, shape index: {}]   ;;  %s262_s3 = inlined_call_operand.vmem [shape: f32[1,2,1], index: 3, kind: output, shape index: {}]  }
   0x1   :  { %9 = vsyncpa [#allocation5], 0  ;;  %s27_s14 = sshll.u32 %s260_s1, 4  ;;  %s214_s15 = smov [#allocation4]   ;;  %s28_s14 = int_to_ptr.hbm [resolvable:$true] %s27_s14 }
   0x2   :  { %s29_s16 = sshll.u32 %s214_s15, 4  ;;  %s14_s19 = sshll.u32 %s259_s0, 4  ;;  %s30_s16 = int_to_ptr.vmem [resolvable:$true] %s29_s16  ;;  %s15_s19 = int_to_ptr.hbm [resolvable:$true] %s14_s19 }
   0x3   :  { %s215_s20 = smov 128   ;;  %s216_s21 = smov 8  }
   0x4   :  { %35 = dma.hbm_to_vmem [thread:$0]  %s28_s14, 256, %s30_s16, [#allocation5], %s215_s20, %s215_s20, %s216_s21  }
   0x5   :  { %s217_s22 = smov [#allocation2]   ;;  %s40_s26 = sshll.u32 %s261_s2, 4  ;;  %s41_s26 = int_to_ptr.hbm [resolvable:$true] %s40_s26 }
   0x6   :  { %s16_s23 = sshll.u32 %s217_s22, 4  ;;  %s218_s1 = smov [#allocation6]   ;;  %s17_s23 = int_to_ptr.vmem [resolvable:$true] %s16_s23 }
   0x7   :  { %22 = dma.hbm_to_vmem [thread:$0]  %s15_s19, 256, %s17_s23, [#allocation3], %s215_s20, %s215_s20, %s216_s21  }
   0x8   :  { %s42_s27 = sshll.u32 %s218_s1, 4  ;;  %s219_s28 = smov 32   ;;  %s43_s27 = int_to_ptr.vmem [resolvable:$true] %s42_s27 }
   0x9   :  { %s220_s29 = smov 2  }
   0xa   :  { %48 = dma.hbm_to_vmem [thread:$0]  %s41_s26, 64, %s43_s27, [#allocation5], %s219_s28, %s219_s28, %s220_s29  }
   0xb   :  { %210 = dma.done.wait [#allocation3], 256  }
   0xc   :  { %211 = vsyncadd [#allocation3], 4294967040 }
   0xd   :  { %212 = dma.done.wait [#allocation5], 320  }
   0xe   :  { %213 = vsyncadd [#allocation5], 4294966976  ;;  %v61_v0 = vld [vmem:[#allocation2] sm:$0xff]  ;;  %v62_v1 = vld [vmem:[#allocation2 + $0x8] sm:$0xff]  ;;  %vm79_vm0 = vcmask 1043456   ;;  %v111_v31 = vlaneseq  ;;  %vm115_vm1 = vcmask 1041409  }
   0xf   :  { %v63_v2 = vld [vmem:[#allocation4] sm:$0xff]  ;;  %v64_v3 = vld [vmem:[#allocation4 + $0x8] sm:$0xff]  ;;  %v65_v4 = vld [vmem:[#allocation6] sm:$0x3]  ;;  %vm118_vm2 = vcmask 25600   ;;  %vm123_vm3 = vcmask 1024  }
  0x10   :  { %v66_v5 = vld [vmem:[#allocation6 + $0x2] sm:$0x3]  ;;  %v67_v6 = vsub.f32 %v61_v0, %v63_v2  ;;  %v68_v7 = vsub.f32 %v62_v1, %v64_v3  ;;  %v73_v8 = vperm.slane %v65_v4, 0  ;;  %v74_v9 = vperm.slane %v65_v4, 1 }
  0x11   :  { %v75_v11 = vperm.slane %v66_v5, 0  ;;  %v76_v12 = vperm.slane %v66_v5, 1  ;;  %v112_v32 = vand.u32 127, %v111_v31 }
  0x12   :  { %v69_v10 = vmul.f32 %v67_v6, %v67_v6  ;;  %v70_v13 = vmul.f32 %v68_v7, %v68_v7  ;;  %v77_v14 = vrot.slane %v74_v9, 4 }
  0x13   :  { %v78_v15 = vrot.slane %v76_v12, 4 }
  0x14   :  { %v80_v16 = vsel %vm79_vm0, %v73_v8, %v77_v14 }
  0x15   :  { %v81_v17 = vsel %vm79_vm0, %v75_v11, %v78_v15  ;;  %v84_v18 = vmul.f32 %v80_v16, %v69_v10 }
  0x16   :  { %v85_v19 = vmul.f32 %v81_v17, %v70_v13 }
  0x17   :  { %88 = vst [vmem:[#allocation1] ss:$2 sm:$0xff] %v84_v18 }
  0x18   :  { %92 = vst [vmem:[#allocation1 + $0x10] ss:$2 sm:$0xff] %v85_v19 }
  0x1e   :  { %v89_v20 = vld.sshfl [vmem:[#allocation1] sm:$0xff pattern:$0x75316420]  ;;  %v90_v21 = vld.sshfl [vmem:[#allocation1 + $0x8] sm:$0xff pattern:$0x75316420] }
  0x1f   :  { %v99_v22 = vsel %vm79_vm0, %v89_v20, 0.0  ;;  %v100_v23 = vsel %vm79_vm0, %v90_v21, 0.0  ;;  %v93_v25 = vld.sshfl [vmem:[#allocation1 + $0x10] sm:$0xff pattern:$0x75316420] }
  0x20   :  { %v101_v24 = vadd.f32 %v100_v23, %v99_v22  ;;  %v94_v26 = vld.sshfl [vmem:[#allocation1 + $0x18] sm:$0xff pattern:$0x75316420]  ;;  %v104_v27 = vsel %vm79_vm0, %v93_v25, 0.0 }
  0x21   :  { %v105_v28 = vsel %vm79_vm0, %v94_v26, 0.0 }
  0x22   :  { %102 = vadd.xlane.f32.xlu0 %v101_v24  ;;  %v106_v29 = vadd.f32 %v105_v28, %v104_v27 }
  0x2a   :  { %107 = vadd.xlane.f32.xlu0 %v106_v29 }
  0x95   :  { %v103_v30 = vpop.xlane.xlu0 %102 }
  0x96   :  { %v113_v34 = vperm.slane %v103_v30, %v112_v32 }
  0x9d   :  { %v108_v33 = vpop.xlane.xlu0 %107 }
  0x9e   :  { %v114_v35 = vperm.slane %v108_v33, %v112_v32 }
  0xa0   :  { %v116_v36 = vsel %vm115_vm1, %v114_v35, %v113_v34 }
  0xa1   :  { %v119_v37 = vsel %vm118_vm2, %v116_v36, 0.0 }
  0xa2   :  { %120 = vadd.xlane.f32.xlu1 %v119_v37 }
 0x115   :  { %v121_v38 = vpop.xlane.xlu1 %120 }
 0x116   :  { %v122_v39 = vmul.f32 0.0009765625, %v121_v38 }
 0x118   :  { %124 = vst.msk [vmem:[%s262_s3] sm:$0x3] %vm123_vm3, %v122_v39 }
 0x119   :  { %129 = vsyncpa [#allocation3], 1 }
 0x11a   :  { %130 = vsyncpa [#allocation5], 1 }

</bundles_post_ra>
